<compile_context>
chip_gen: v7x
topology: tpu7x:2x2x1
jax: 0.10.0
libtpu: 0.0.40
codegen_flags: <defaults>
</compile_context>

<pallas_src>
import functools

import jax
import jax.numpy as jnp
from jax.experimental import pallas as pl
from jax.experimental.pallas import tpu as pltpu

STATE_DIM = 3
ACTION_DIM = 3
H1 = 128
H2 = 64
STD_MIN = 0.05
STD_SCALE = 2.0
BLOCK_B = 2048   # batch tile on the lane axis; multiple of 128
MIN_TILE = 1024  # don't split into tiles smaller than this (per-step overhead)

_LOG_SQRT_2PI = 0.5 * float(jnp.log(2.0 * jnp.pi))
_LOG2 = float(jnp.log(2.0))


def _sac_actor_kernel(x_ref, eps_ref, w1_ref, b1_ref, w2_ref, b2_ref,
                      wh_ref, bh_ref, c_ref, out_ref, *, state_dim, action_dim):
    """Transposed layout: all activations are (features, batch_tile)."""
    A = action_dim
    xT = x_ref[...]                                    # (S, TB)

    # ---- fc1 + relu on the VPU (K = state_dim = 3; skip MXU fill/drain) -----
    # Bias folded into the first accumulator term (saves one (H1, TB) vadd).
    h1 = b1_ref[...] + w1_ref[:, 0:1] * xT[0:1, :]     # (H1, 1) * (1, TB)
    for k in range(1, state_dim):
        h1 = h1 + w1_ref[:, k:k + 1] * xT[k:k + 1, :]
    h1 = jnp.maximum(h1, 0.0)                          # (H1, TB)

    # ---- fc2 + relu (MXU) ----------------------------------------------------
    h2 = jnp.dot(w2_ref[...], h1, preferred_element_type=jnp.float32)
    h2 = jnp.maximum(h2 + b2_ref[...], 0.0)            # (H2, TB)

    # ---- fused mean / log_std head: one MXU matmul -> (2A, TB) ---------------
    heads = jnp.dot(wh_ref[...], h2, preferred_element_type=jnp.float32)
    heads = heads + bh_ref[...]
    mean = heads[:A, :]
    log_std = heads[A:, :]

    # ---- packed constants: [clamp_lo; clamp_hi; gain; off], each (A, 1) ------
    c = c_ref[...]                                     # (4A, 1)
    lo = c[0 * A:1 * A, :]
    hi = c[1 * A:2 * A, :]
    gain = c[2 * A:3 * A, :]
    off = c[3 * A:4 * A, :]

    # clamp (lower bound is log()'d, upper bound is not -- matches PyTorch code)
    log_std = jnp.minimum(jnp.maximum(log_std, lo), hi)
    std = jnp.exp(log_std)

    # reparameterized sample: a = mean + std * eps   (deterministic=False path)
    eps = eps_ref[...]                                 # (A, TB)
    a = mean + std * eps

    # Normal(mean, std).log_prob(a) with z == eps exactly, fused with the tanh
    # change-of-variables correction into ONE sublane reduction:
    #   log_pi = sum_A[-0.5*eps^2 - log_std + 2*(a + softplus(-2a))]
    #            - A*(log(sqrt(2*pi)) + 2*log(2))
    neg2a = -2.0 * a
    sp = jnp.maximum(neg2a, 0.0) + jnp.log1p(jnp.exp(-jnp.abs(neg2a)))
    per_elem = 2.0 * (a + sp) - 0.5 * (eps * eps) - log_std
    log_pi = (jnp.sum(per_elem, axis=0, keepdims=True)
              - float(A) * (_LOG_SQRT_2PI + 2.0 * _LOG2))   # (1, TB)

    # squash + affine rescale into [a_min, a_max]
    a_sq = jnp.tanh(a) * gain + off                    # (A, TB)

    # single packed output slab: rows [0:A] -> action, row [A] -> log_pi
    out_ref[0:A, :] = a_sq.astype(out_ref.dtype)
    out_ref[A:A + 1, :] = log_pi.astype(out_ref.dtype)


def pack_constants(a_min, a_max, std_min=STD_MIN, std_scale=STD_SCALE):
    """Derived constants, packed into one (4A, 1) f32 array (compute once,
    reuse across steps).  NOTE: if a_max == a_min for a dim, clamp_lo =
    log(0) = -inf, faithfully reproducing the PyTorch behavior; the kernel
    stays NaN-free regardless since z == eps."""
    A = int(a_min.shape[0])
    off = (a_min + a_max) * 0.5
    gain = a_max - off
    clamp_lo = jnp.log(std_min * (a_max - a_min) * 0.5)
    clamp_hi = (a_max - a_min) * 0.5 / std_scale
    consts = jnp.concatenate([clamp_lo, clamp_hi, gain, off]).astype(jnp.float32)
    return consts.reshape(4 * A, 1)


def _choose_tile(batch, block_b, min_tile):
    """Pick the lane-axis batch tile.
    - small / moderate batches: one tile (per-step overhead dominates anyway)
    - large batches: ~block_b tiles, capped at ceil(B/2) rounded up to 128 so
      the ("parallel",) grid has >= 2 steps and v7x can use both TensorCores,
      but never smaller than min_tile lanes."""
    assert block_b % 128 == 0
    min_tile = max(128, ((min_tile + 127) // 128) * 128)
    if batch <= min_tile:
        return batch, 1
    half = (((batch + 1) // 2) + 127) // 128 * 128
    tb = min(block_b, max(min_tile, half))
    return tb, pl.cdiv(batch, tb)


def sac_actor_forward_packed(xT, epsT, params, consts,
                             block_b=BLOCK_B, min_tile=MIN_TILE):
    """Zero-layout-overhead entry point.

    xT: (S, B) f32, epsT: (A, B) f32, consts: (4A, 1) f32 from pack_constants.
    Returns the (A+1, B) f32 slab: rows [0:A] = squashed action (transposed),
    row [A] = log_pi.
    """
    S, B = xT.shape
    A = epsT.shape[0]
    if xT.dtype != jnp.float32:
        xT = xT.astype(jnp.float32)
    if epsT.dtype != jnp.float32:
        epsT = epsT.astype(jnp.float32)

    tb, n_blocks = _choose_tile(B, block_b, min_tile)

    kernel = functools.partial(_sac_actor_kernel, state_dim=S, action_dim=A)

    def batch_spec(feat):
        return pl.BlockSpec((feat, tb), lambda i: (0, i))

    def resident_spec(r, c):
        # weights / constants: same block every grid step -> stays VMEM-resident
        return pl.BlockSpec((r, c), lambda i: (0, 0))

    return pl.pallas_call(
        kernel,
        out_shape=jax.ShapeDtypeStruct((A + 1, B), jnp.float32),
        grid_spec=pltpu.PrefetchScalarGridSpec(
            num_scalar_prefetch=0,
            grid=(n_blocks,),
            in_specs=[
                batch_spec(S),                       # xT     (S, B)
                batch_spec(A),                       # epsT   (A, B)
                resident_spec(*params["w1"].shape),  # (H1, S)
                resident_spec(*params["b1"].shape),  # (H1, 1)
                resident_spec(*params["w2"].shape),  # (H2, H1)
                resident_spec(*params["b2"].shape),  # (H2, 1)
                resident_spec(*params["wh"].shape),  # (2A, H2)
                resident_spec(*params["bh"].shape),  # (2A, 1)
                resident_spec(*consts.shape),        # (4A, 1) packed constants
            ],
            out_specs=pl.BlockSpec((A + 1, tb), lambda i: (0, i)),
        ),
        compiler_params=pltpu.CompilerParams(
            dimension_semantics=("parallel",)),
    )(xT, epsT, params["w1"], params["b1"], params["w2"], params["b2"],
      params["wh"], params["bh"], consts)


def sac_actor_forward(x, eps, params, a_min, a_max,
                      std_min=STD_MIN, std_scale=STD_SCALE,
                      block_b=BLOCK_B, min_tile=MIN_TILE):
    """PyTorch-layout compatibility wrapper (stochastic, with_logprob=True).

    x: (B, S), eps: (B, A) reparameterization noise.  Returns (a (B, A),
    log_pi (B, 1)).  The only non-Pallas ops are the tiny (B,3) transposes and
    the final slab slice+transpose; callers on the hot path should use
    sac_actor_forward_packed directly with cached transposed layouts."""
    B = x.shape[0]
    A = int(a_min.shape[0])
    consts = pack_constants(a_min, a_max, std_min, std_scale)
    out = sac_actor_forward_packed(x.T.astype(jnp.float32),
                                   eps.T.astype(jnp.float32),
                                   params, consts,
                                   block_b=block_b, min_tile=min_tile)
    a = out[:A, :].T                         # (B, A)
    log_pi = out[A:A + 1, :].T               # (B, 1)
    del B
    return a, log_pi


def _orthogonal(key, shape, gain):
    return gain * jax.nn.initializers.orthogonal()(key, shape, jnp.float32)


def init_params(key):
    """Orthogonal init matching the module, PyTorch-native (out, in) layout.
    The mean / log_std heads are stored fused: wh=(2A, H2), bh=(2A, 1)."""
    k1, k2, k3, k4 = jax.random.split(key, 4)
    wm = _orthogonal(k3, (ACTION_DIM, H2), 0.01)
    ws = _orthogonal(k4, (ACTION_DIM, H2), 0.01)
    return {
        "w1": _orthogonal(k1, (H1, STATE_DIM), 1.0),
        "b1": jnp.zeros((H1, 1), jnp.float32),
        "w2": _orthogonal(k2, (H2, H1), 1.0),
        "b2": jnp.zeros((H2, 1), jnp.float32),
        "wh": jnp.concatenate([wm, ws], axis=0),
        "bh": jnp.zeros((2 * ACTION_DIM, 1), jnp.float32),
    }


def _reference_forward(x, eps, params, a_min, a_max,
                       std_min=STD_MIN, std_scale=STD_SCALE):
    """Pure-JAX reference of the PyTorch forward (for validation)."""
    A = a_min.shape[0]
    h1 = jax.nn.relu(x @ params["w1"].T + params["b1"][:, 0])
    h2 = jax.nn.relu(h1 @ params["w2"].T + params["b2"][:, 0])
    heads = h2 @ params["wh"].T + params["bh"][:, 0]
    mean, log_std = heads[:, :A], heads[:, A:]
    lo = jnp.log(std_min * (a_max - a_min) / 2.0)
    hi = (a_max - a_min) / 2.0 / std_scale
    log_std = jnp.clip(log_std, lo, hi)
    std = jnp.exp(log_std)
    a = mean + std * eps
    log_prob = -0.5 * ((a - mean) / std) ** 2 - log_std - 0.5 * jnp.log(2.0 * jnp.pi)
    log_pi = jnp.sum(log_prob, axis=1, keepdims=True)
    corr = 2.0 * (jnp.log(2.0) - a - jax.nn.softplus(-2.0 * a))
    log_pi = log_pi - jnp.sum(corr, axis=1, keepdims=True)
    off = (a_min + a_max) / 2.0
    gain = a_max - off
    return jnp.tanh(a) * gain + off, log_pi


if __name__ == "__main__":
    key = jax.random.PRNGKey(0)
    k_param, k_x, k_eps = jax.random.split(key, 3)

    params = init_params(k_param)
    a_min = jnp.zeros((ACTION_DIM,), jnp.float32)
    a_max = jnp.ones((ACTION_DIM,), jnp.float32)

    fwd = jax.jit(sac_actor_forward, static_argnames=("block_b", "min_tile"))

    # --- small batch (single-tile path) --------------------------------------
    B = 8
    x = jax.random.normal(k_x, (B, STATE_DIM), jnp.float32)
    eps = jax.random.normal(k_eps, (B, ACTION_DIM), jnp.float32)  # rsample noise
    a_out, logpi_out = fwd(x, eps, params, a_min, a_max)
    jax.block_until_ready((a_out, logpi_out))
    a_ref, logpi_ref = _reference_forward(x, eps, params, a_min, a_max)
    assert a_out.shape == (B, ACTION_DIM) and logpi_out.shape == (B, 1)
    assert jnp.allclose(a_out, a_ref, atol=1e-4, rtol=1e-5)
    assert jnp.allclose(logpi_out, logpi_ref, atol=1e-4, rtol=1e-5)

    # --- multi-block + ragged edge-block path (no explicit padding) ----------
    # (small tile forced to exercise the batch grid and masked edge block)
    B2 = 200
    x2 = jax.random.normal(jax.random.fold_in(k_x, 1), (B2, STATE_DIM), jnp.float32)
    eps2 = jax.random.normal(jax.random.fold_in(k_eps, 1), (B2, ACTION_DIM), jnp.float32)
    a2, lp2 = fwd(x2, eps2, params, a_min, a_max, block_b=128, min_tile=128)
    jax.block_until_ready((a2, lp2))
    a2_ref, lp2_ref = _reference_forward(x2, eps2, params, a_min, a_max)
    assert a2.shape == (B2, ACTION_DIM) and lp2.shape == (B2, 1)
    assert jnp.allclose(a2, a2_ref, atol=1e-4, rtol=1e-5)
    assert jnp.allclose(lp2, lp2_ref, atol=1e-4, rtol=1e-5)

    print("KERNEL_OK")
</pallas_src>

<mosaic_0001>
module attributes {stable_mosaic.version = 11 : i64} {
  func.func @_sac_actor_kernel(%arg0: i32, %arg1: memref<3x8xf32, #tpu.memory_space<vmem>>, %arg2: memref<3x8xf32, #tpu.memory_space<vmem>>, %arg3: memref<128x3xf32, #tpu.memory_space<vmem>>, %arg4: memref<128x1xf32, #tpu.memory_space<vmem>>, %arg5: memref<64x128xf32, #tpu.memory_space<vmem>>, %arg6: memref<64x1xf32, #tpu.memory_space<vmem>>, %arg7: memref<6x64xf32, #tpu.memory_space<vmem>>, %arg8: memref<6x1xf32, #tpu.memory_space<vmem>>, %arg9: memref<12x1xf32, #tpu.memory_space<vmem>>, %arg10: memref<4x8xf32, #tpu.memory_space<vmem>>) attributes {dimension_semantics = [#tpu.dimension_semantics<parallel>], iteration_bounds = array<i64: 1>, scalar_prefetch = 0 : i64, scratch_operands = 0 : i64, tpu.core_type = #tpu.core_type<tc>, window_params = [{transform_indices = @transform_0, window_bounds = array<i64: 3, 8>}, {transform_indices = @transform_1, window_bounds = array<i64: 3, 8>}, {pipeline_mode = #tpu.pipeline_mode<synchronous>, transform_indices = @transform_2, window_bounds = array<i64: 128, 3>}, {pipeline_mode = #tpu.pipeline_mode<synchronous>, transform_indices = @transform_3, window_bounds = array<i64: 128, 1>}, {pipeline_mode = #tpu.pipeline_mode<synchronous>, transform_indices = @transform_4, window_bounds = array<i64: 64, 128>}, {pipeline_mode = #tpu.pipeline_mode<synchronous>, transform_indices = @transform_5, window_bounds = array<i64: 64, 1>}, {pipeline_mode = #tpu.pipeline_mode<synchronous>, transform_indices = @transform_6, window_bounds = array<i64: 6, 64>}, {pipeline_mode = #tpu.pipeline_mode<synchronous>, transform_indices = @transform_7, window_bounds = array<i64: 6, 1>}, {pipeline_mode = #tpu.pipeline_mode<synchronous>, transform_indices = @transform_8, window_bounds = array<i64: 12, 1>}, {transform_indices = @transform_9, window_bounds = array<i64: 4, 8>}]} {
    %c0 = arith.constant 0 : index
    %c0_0 = arith.constant 0 : index
    %0 = vector.load %arg1[%c0, %c0_0] : memref<3x8xf32, #tpu.memory_space<vmem>>, vector<3x8xf32>
    %c0_1 = arith.constant 0 : index
    %c0_2 = arith.constant 0 : index
    %1 = vector.load %arg4[%c0_1, %c0_2] : memref<128x1xf32, #tpu.memory_space<vmem>>, vector<128x1xf32>
    %c0_3 = arith.constant 0 : index
    %c0_4 = arith.constant 0 : index
    %2 = vector.load %arg3[%c0_3, %c0_4] : memref<128x3xf32, #tpu.memory_space<vmem>>, vector<128x1xf32>
    %3 = vector.extract_strided_slice %0 {offsets = [0, 0], sizes = [1, 8], strides = [1, 1]} : vector<3x8xf32> to vector<1x8xf32>
    %4 = vector.broadcast %2 : vector<128x1xf32> to vector<128x8xf32>
    %5 = vector.broadcast %3 : vector<1x8xf32> to vector<128x8xf32>
    %6 = arith.mulf %4, %5 : vector<128x8xf32>
    %7 = vector.broadcast %1 : vector<128x1xf32> to vector<128x8xf32>
    %8 = arith.addf %7, %6 : vector<128x8xf32>
    %c0_5 = arith.constant 0 : index
    %c1 = arith.constant 1 : index
    %9 = vector.load %arg3[%c0_5, %c1] : memref<128x3xf32, #tpu.memory_space<vmem>>, vector<128x1xf32>
    %10 = vector.extract_strided_slice %0 {offsets = [1, 0], sizes = [1, 8], strides = [1, 1]} : vector<3x8xf32> to vector<1x8xf32>
    %11 = vector.broadcast %9 : vector<128x1xf32> to vector<128x8xf32>
    %12 = vector.broadcast %10 : vector<1x8xf32> to vector<128x8xf32>
    %13 = arith.mulf %11, %12 : vector<128x8xf32>
    %14 = arith.addf %8, %13 : vector<128x8xf32>
    %c0_6 = arith.constant 0 : index
    %c2 = arith.constant 2 : index
    %15 = vector.load %arg3[%c0_6, %c2] : memref<128x3xf32, #tpu.memory_space<vmem>>, vector<128x1xf32>
    %16 = vector.extract_strided_slice %0 {offsets = [2, 0], sizes = [1, 8], strides = [1, 1]} : vector<3x8xf32> to vector<1x8xf32>
    %17 = vector.broadcast %15 : vector<128x1xf32> to vector<128x8xf32>
    %18 = vector.broadcast %16 : vector<1x8xf32> to vector<128x8xf32>
    %19 = arith.mulf %17, %18 : vector<128x8xf32>
    %20 = arith.addf %14, %19 : vector<128x8xf32>
    %cst = arith.constant 0.000000e+00 : f32
    %21 = vector.broadcast %cst : f32 to vector<128x8xf32>
    %22 = arith.maximumf %20, %21 : vector<128x8xf32>
    %c0_7 = arith.constant 0 : index
    %c0_8 = arith.constant 0 : index
    %23 = vector.load %arg5[%c0_7, %c0_8] : memref<64x128xf32, #tpu.memory_space<vmem>>, vector<64x128xf32>
    %cst_9 = arith.constant dense<0.000000e+00> : vector<64x8xf32>
    %24 = tpu.matmul %23, %22, %cst_9 {dimension_numbers = #tpu.dot_dimension_numbers<[1], [0], [0], [1], [0, 0, 1, 1], [], []>} : vector<64x128xf32>, vector<128x8xf32>, vector<64x8xf32> -> vector<64x8xf32>
    %c0_10 = arith.constant 0 : index
    %c0_11 = arith.constant 0 : index
    %25 = vector.load %arg6[%c0_10, %c0_11] : memref<64x1xf32, #tpu.memory_space<vmem>>, vector<64x1xf32>
    %26 = vector.broadcast %25 : vector<64x1xf32> to vector<64x8xf32>
    %27 = arith.addf %24, %26 : vector<64x8xf32>
    %cst_12 = arith.constant 0.000000e+00 : f32
    %28 = vector.broadcast %cst_12 : f32 to vector<64x8xf32>
    %29 = arith.maximumf %27, %28 : vector<64x8xf32>
    %c0_13 = arith.constant 0 : index
    %c0_14 = arith.constant 0 : index
    %30 = vector.load %arg7[%c0_13, %c0_14] : memref<6x64xf32, #tpu.memory_space<vmem>>, vector<6x64xf32>
    %cst_15 = arith.constant dense<0.000000e+00> : vector<6x8xf32>
    %31 = tpu.matmul %30, %29, %cst_15 {dimension_numbers = #tpu.dot_dimension_numbers<[1], [0], [0], [1], [0, 0, 1, 1], [], []>} : vector<6x64xf32>, vector<64x8xf32>, vector<6x8xf32> -> vector<6x8xf32>
    %c0_16 = arith.constant 0 : index
    %c0_17 = arith.constant 0 : index
    %32 = vector.load %arg8[%c0_16, %c0_17] : memref<6x1xf32, #tpu.memory_space<vmem>>, vector<6x1xf32>
    %33 = vector.broadcast %32 : vector<6x1xf32> to vector<6x8xf32>
    %34 = arith.addf %31, %33 : vector<6x8xf32>
    %35 = vector.extract_strided_slice %34 {offsets = [0, 0], sizes = [3, 8], strides = [1, 1]} : vector<6x8xf32> to vector<3x8xf32>
    %36 = vector.extract_strided_slice %34 {offsets = [3, 0], sizes = [3, 8], strides = [1, 1]} : vector<6x8xf32> to vector<3x8xf32>
    %c0_18 = arith.constant 0 : index
    %c0_19 = arith.constant 0 : index
    %37 = vector.load %arg9[%c0_18, %c0_19] : memref<12x1xf32, #tpu.memory_space<vmem>>, vector<12x1xf32>
    %38 = vector.extract_strided_slice %37 {offsets = [0, 0], sizes = [3, 1], strides = [1, 1]} : vector<12x1xf32> to vector<3x1xf32>
    %39 = vector.extract_strided_slice %37 {offsets = [3, 0], sizes = [3, 1], strides = [1, 1]} : vector<12x1xf32> to vector<3x1xf32>
    %40 = vector.extract_strided_slice %37 {offsets = [6, 0], sizes = [3, 1], strides = [1, 1]} : vector<12x1xf32> to vector<3x1xf32>
    %41 = vector.extract_strided_slice %37 {offsets = [9, 0], sizes = [3, 1], strides = [1, 1]} : vector<12x1xf32> to vector<3x1xf32>
    %42 = vector.broadcast %38 : vector<3x1xf32> to vector<3x8xf32>
    %43 = arith.maximumf %36, %42 : vector<3x8xf32>
    %44 = vector.broadcast %39 : vector<3x1xf32> to vector<3x8xf32>
    %45 = arith.minimumf %43, %44 : vector<3x8xf32>
    %46 = math.exp %45 : vector<3x8xf32>
    %c0_20 = arith.constant 0 : index
    %c0_21 = arith.constant 0 : index
    %47 = vector.load %arg2[%c0_20, %c0_21] : memref<3x8xf32, #tpu.memory_space<vmem>>, vector<3x8xf32>
    %48 = arith.mulf %46, %47 : vector<3x8xf32>
    %49 = arith.addf %35, %48 : vector<3x8xf32>
    %cst_22 = arith.constant -2.000000e+00 : f32
    %50 = vector.broadcast %cst_22 : f32 to vector<3x8xf32>
    %51 = arith.mulf %50, %49 : vector<3x8xf32>
    %cst_23 = arith.constant 0.000000e+00 : f32
    %52 = vector.broadcast %cst_23 : f32 to vector<3x8xf32>
    %53 = arith.maximumf %51, %52 : vector<3x8xf32>
    %54 = math.absf %51 : vector<3x8xf32>
    %cst_24 = arith.constant 0.000000e+00 : f32
    %55 = vector.broadcast %cst_24 : f32 to vector<3x8xf32>
    %56 = arith.subf %55, %54 : vector<3x8xf32>
    %57 = math.exp %56 : vector<3x8xf32>
    %58 = math.log1p %57 : vector<3x8xf32>
    %59 = arith.addf %53, %58 : vector<3x8xf32>
    %60 = arith.addf %49, %59 : vector<3x8xf32>
    %cst_25 = arith.constant 2.000000e+00 : f32
    %61 = vector.broadcast %cst_25 : f32 to vector<3x8xf32>
    %62 = arith.mulf %61, %60 : vector<3x8xf32>
    %63 = arith.mulf %47, %47 : vector<3x8xf32>
    %cst_26 = arith.constant 5.000000e-01 : f32
    %64 = vector.broadcast %cst_26 : f32 to vector<3x8xf32>
    %65 = arith.mulf %64, %63 : vector<3x8xf32>
    %66 = arith.subf %62, %65 : vector<3x8xf32>
    %67 = arith.subf %66, %45 : vector<3x8xf32>
    %cst_27 = arith.constant dense<0.000000e+00> : vector<8xf32>
    %68 = vector.multi_reduction <add>, %67, %cst_27 [0] : vector<3x8xf32> to vector<8xf32>
    %69 = vector.shape_cast %68 : vector<8xf32> to vector<1x8xf32>
    %cst_28 = arith.constant 6.91569853 : f32
    %70 = vector.broadcast %cst_28 : f32 to vector<1x8xf32>
    %71 = arith.subf %69, %70 : vector<1x8xf32>
    %72 = math.tanh %49 : vector<3x8xf32>
    %73 = vector.broadcast %40 : vector<3x1xf32> to vector<3x8xf32>
    %74 = arith.mulf %72, %73 : vector<3x8xf32>
    %75 = vector.broadcast %41 : vector<3x1xf32> to vector<3x8xf32>
    %76 = arith.addf %74, %75 : vector<3x8xf32>
    %c0_29 = arith.constant 0 : index
    %c0_30 = arith.constant 0 : index
    %77 = vector.load %arg10[%c0_29, %c0_30] : memref<4x8xf32, #tpu.memory_space<vmem>>, vector<3x8xf32>
    tpu.vector_store %arg10[%c0_29, %c0_30], %76 {strides = array<i32>} : memref<4x8xf32, #tpu.memory_space<vmem>>, vector<3x8xf32>,
    %c3 = arith.constant 3 : index
    %c0_31 = arith.constant 0 : index
    %78 = vector.load %arg10[%c3, %c0_31] : memref<4x8xf32, #tpu.memory_space<vmem>>, vector<1x8xf32>
    tpu.vector_store %arg10[%c3, %c0_31], %71 {strides = array<i32>} : memref<4x8xf32, #tpu.memory_space<vmem>>, vector<1x8xf32>,
    return
  }
  func.func @transform_0(%arg0: i32) -> (i32, i32) {
    %c0_i32 = arith.constant 0 : i32
    %c0_i32_0 = arith.constant 0 : i32
    return %c0_i32, %arg0 : i32, i32
  }
  func.func @transform_1(%arg0: i32) -> (i32, i32) {
    %c0_i32 = arith.constant 0 : i32
    %c0_i32_0 = arith.constant 0 : i32
    return %c0_i32, %arg0 : i32, i32
  }
  func.func @transform_2(%arg0: i32) -> (i32, i32) {
    %c0_i32 = arith.constant 0 : i32
    %c0_i32_0 = arith.constant 0 : i32
    %c0_i32_1 = arith.constant 0 : i32
    return %c0_i32, %c0_i32_0 : i32, i32
  }
  func.func @transform_3(%arg0: i32) -> (i32, i32) {
    %c0_i32 = arith.constant 0 : i32
    %c0_i32_0 = arith.constant 0 : i32
    %c0_i32_1 = arith.constant 0 : i32
    return %c0_i32, %c0_i32_0 : i32, i32
  }
  func.func @transform_4(%arg0: i32) -> (i32, i32) {
    %c0_i32 = arith.constant 0 : i32
    %c0_i32_0 = arith.constant 0 : i32
    %c0_i32_1 = arith.constant 0 : i32
    return %c0_i32, %c0_i32_0 : i32, i32
  }
  func.func @transform_5(%arg0: i32) -> (i32, i32) {
    %c0_i32 = arith.constant 0 : i32
    %c0_i32_0 = arith.constant 0 : i32
    %c0_i32_1 = arith.constant 0 : i32
    return %c0_i32, %c0_i32_0 : i32, i32
  }
  func.func @transform_6(%arg0: i32) -> (i32, i32) {
    %c0_i32 = arith.constant 0 : i32
    %c0_i32_0 = arith.constant 0 : i32
    %c0_i32_1 = arith.constant 0 : i32
    return %c0_i32, %c0_i32_0 : i32, i32
  }
  func.func @transform_7(%arg0: i32) -> (i32, i32) {
    %c0_i32 = arith.constant 0 : i32
    %c0_i32_0 = arith.constant 0 : i32
    %c0_i32_1 = arith.constant 0 : i32
    return %c0_i32, %c0_i32_0 : i32, i32
  }
  func.func @transform_8(%arg0: i32) -> (i32, i32) {
    %c0_i32 = arith.constant 0 : i32
    %c0_i32_0 = arith.constant 0 : i32
    %c0_i32_1 = arith.constant 0 : i32
    return %c0_i32, %c0_i32_0 : i32, i32
  }
  func.func @transform_9(%arg0: i32) -> (i32, i32) {
    %c0_i32 = arith.constant 0 : i32
    %c0_i32_0 = arith.constant 0 : i32
    return %c0_i32, %arg0 : i32, i32
  }
}

</mosaic_0001>

<bundles_post_ra>
// kernel: sac_actor_forward.1
= control target key start
LH: loop header
LB: loop body
LE: loop exit
PB: predicated region body
PF: predicated region fallthrough
CT: control target
= control target key end

     0   :  { %v996_v0 = vmov 0   ;;  %v997_v6 = vmov 1   ;;  %v998_v11 = vmov 2   ;;  %v145_v57 = vlaneseq  ;;  %s1404_s3 = inlined_call_operand.vmem [shape: f32[128,1], index: 3, kind: input, shape index: {}]   ;;  %s1405_s2 = inlined_call_operand.vmem [shape: f32[128,3], index: 2, kind: input, shape index: {}]   ;;  %s1406_s0 = inlined_call_operand.vmem [shape: f32[3,8], index: 0, kind: input, shape index: {}]   ;;  %s1407_s4 = inlined_call_operand.vmem [shape: f32[64,128], index: 4, kind: input, shape index: {}]   ;;  %s1408_s5 = inlined_call_operand.vmem [shape: f32[64,1], index: 5, kind: input, shape index: {}]   ;;  %s1409_s8 = inlined_call_operand.vmem [shape: f32[12,1], index: 8, kind: input, shape index: {}]   ;;  %s1410_s7 = inlined_call_operand.vmem [shape: f32[6,1], index: 7, kind: input, shape index: {}]   ;;  %s1411_s6 = inlined_call_operand.vmem [shape: f32[6,64], index: 6, kind: input, shape index: {}]   ;;  %s1412_s1 = inlined_call_operand.vmem [shape: f32[3,8], index: 1, kind: input, shape index: {}]   ;;  %s1413_s9 = inlined_call_operand.vmem [shape: f32[4,8], index: 9, kind: output, shape index: {}]  }
   0x1   :  { %953 = vset.pattern.permute.xlu1 %v996_v0  ;;  %952 = vset.pattern.permute.xlu0 %v996_v0  ;;  %v33_v1 = vld [vmem:[%s1404_s3] sm:$0xff]  ;;  %v34_v3 = vld [vmem:[%s1404_s3 + $0x8] sm:$0xff]  ;;  %v52_v5 = vld [vmem:[%s1405_s2 + $0x18] sm:$0xff]  ;;  %vm1000_vm0 = vmmov 0   ;;  %vm653_vm1 = vcmask 523264   ;;  %vm788_vm2 = vcmask 1041408  }
   0x2   :  { %v1060_v2 = vld [vmem:[%s1405_s2] sm:$0xff]  ;;  %167 = vperm.xlu1 %953, %v33_v1   ;;  %v50_v4 = vld [vmem:[%s1405_s2 + $0x8] sm:$0xff]  ;;  %v35_v7 = vld [vmem:[%s1404_s3 + $0x10] sm:$0xff]  ;;  %v146_v60 = vshrl.u32 %v145_v57, 7  ;;  %vm774_vm3 = vcmask 59392   ;;  %vm798_vm5 = vcmask 57344  }
   0x3   :  { %67 = vperm.xlu0 %952, %v1060_v2   ;;  %v51_v8 = vld [vmem:[%s1405_s2 + $0x10] sm:$0xff]  ;;  %v54_v9 = vld [vmem:[%s1405_s2 + $0x28] sm:$0xff]  ;;  %v37_v10 = vld [vmem:[%s1404_s3 + $0x20] sm:$0xff] }
   0x4   :  { %v1091_v12 = vld [vmem:[%s1405_s2 + $0x38] sm:$0xff]  ;;  %v39_v14 = vld [vmem:[%s1404_s3 + $0x30] sm:$0xff]  ;;  %v1104_v15 = vld [vmem:[%s1405_s2 + $0x48] sm:$0xff]  ;;  %v147_v63 = vsub.s32 0, %v146_v60  ;;  %v327_v1 = vsub.s32 1, %v146_v60 }
   0x5   :  { %v36_v13 = vld [vmem:[%s1404_s3 + $0x18] sm:$0xff]  ;;  %v41_v16 = vld [vmem:[%s1404_s3 + $0x40] sm:$0xff]  ;;  %v43_v19 = vld [vmem:[%s1404_s3 + $0x50] sm:$0xff] }
   0x6   :  { %172 = vperm.xlu1 %953, %v34_v3   ;;  %v53_v17 = vld [vmem:[%s1405_s2 + $0x20] sm:$0xff]  ;;  %v1118_v18 = vld [vmem:[%s1405_s2 + $0x58] sm:$0xff]  ;;  %v1128_v20 = vld [vmem:[%s1405_s2 + $0x68] sm:$0xff] }
   0x7   :  { %72 = vperm.xlu0 %952, %v50_v4   ;;  %v38_v21 = vld [vmem:[%s1404_s3 + $0x28] sm:$0xff]  ;;  %v45_v22 = vld [vmem:[%s1404_s3 + $0x60] sm:$0xff]  ;;  %v1141_v23 = vld [vmem:[%s1405_s2 + $0x78] sm:$0xff] }
   0x8   :  { %v47_v24 = vld [vmem:[%s1404_s3 + $0x70] sm:$0xff]  ;;  %v40_v26 = vld [vmem:[%s1404_s3 + $0x38] sm:$0xff]  ;;  %v57_v27 = vld [vmem:[%s1405_s2 + $0x40] sm:$0xff] }
   0x9   :  { %v55_v25 = vld [vmem:[%s1405_s2 + $0x30] sm:$0xff]  ;;  %v61_v29 = vld [vmem:[%s1405_s2 + $0x60] sm:$0xff]  ;;  %v42_v31 = vld [vmem:[%s1404_s3 + $0x48] sm:$0xff] }
   0xa   :  { %954 = vset.pattern.permute.xlu1 %v997_v6  ;;  %v59_v28 = vld [vmem:[%s1405_s2 + $0x50] sm:$0xff]  ;;  %v44_v32 = vld [vmem:[%s1404_s3 + $0x58] sm:$0xff]  ;;  %v46_v42 = vld [vmem:[%s1404_s3 + $0x68] sm:$0xff] }
   0xb   :  { %82 = vperm.xlu0 %952, %v52_v5   ;;  %266 = vperm.xlu1 %954, %v50_v4   ;;  %v1175_v30 = vld [vmem:[%s1405_s2 + $0x70] sm:$0xff]  ;;  %v48_v54 = vld [vmem:[%s1404_s3 + $0x78] sm:$0xff] }
   0xf   :  { %177 = vperm.xlu0 %952, %v35_v7   ;;  %955 = vset.pattern.permute.xlu1 %v996_v0 }
  0x10   :  { %77 = vperm.xlu1 %955, %v51_v8  }
  0x13   :  { %92 = vperm.xlu0 %952, %v54_v9  }
  0x14   :  { %956 = vset.pattern.permute.xlu1 %v998_v11 }
  0x15   :  { %362 = vperm.xlu1 %956, %v1060_v2  }
  0x17   :  { %187 = vperm.xlu0 %952, %v37_v10  }
  0x19   :  { %366 = vperm.xlu1 %956, %v50_v4  }
  0x1b   :  { %102 = vperm.xlu0 %952, %v1091_v12  }
  0x1d   :  { %957 = vset.pattern.permute.xlu1 %v996_v0 }
  0x1e   :  { %182 = vperm.xlu1 %957, %v36_v13  }
  0x1f   :  { %197 = vperm.xlu0 %952, %v39_v14  }
  0x22   :  { %958 = vset.pattern.permute.xlu1 %v997_v6 }
  0x23   :  { %112 = vperm.xlu0 %952, %v1104_v15   ;;  %274 = vperm.xlu1 %958, %v52_v5  }
  0x27   :  { %207 = vperm.xlu0 %952, %v41_v16   ;;  %959 = vset.pattern.permute.xlu1 %v996_v0 }
  0x28   :  { %87 = vperm.xlu1 %959, %v53_v17  }
  0x2b   :  { %122 = vperm.xlu0 %952, %v1118_v18  }
  0x2c   :  { %960 = vset.pattern.permute.xlu1 %v998_v11 }
  0x2d   :  { %370 = vperm.xlu1 %960, %v51_v8  }
  0x2f   :  { %217 = vperm.xlu0 %952, %v43_v19   ;;  %v477_v19 = vld [vmem:[%s1407_s4] sm:$0xff] }
  0x30   :  { %871 = vmatprep.mubr.f32.mxu0 %v477_v19 }
  0x31   :  { %374 = vperm.xlu1 %960, %v52_v5  }
  0x33   :  { %132 = vperm.xlu0 %952, %v1128_v20  }
  0x35   :  { %961 = vset.pattern.permute.xlu1 %v996_v0 }
  0x36   :  { %192 = vperm.xlu1 %961, %v38_v21  }
  0x37   :  { %227 = vperm.xlu0 %952, %v45_v22  }
  0x3a   :  { %962 = vset.pattern.permute.xlu1 %v997_v6 }
  0x3b   :  { %142 = vperm.xlu0 %952, %v1141_v23   ;;  %282 = vperm.xlu1 %962, %v54_v9  }
  0x3f   :  { %237 = vperm.xlu0 %952, %v47_v24   ;;  %963 = vset.pattern.permute.xlu1 %v996_v0 }
  0x40   :  { %97 = vperm.xlu1 %963, %v55_v25  }
  0x43   :  { %981 = vset.pattern.permute.xlu0 %v997_v6 }
  0x44   :  { %262 = vperm.xlu0 %981, %v1060_v2   ;;  %964 = vset.pattern.permute.xlu1 %v998_v11  ;;  %v32_v2 = vld [vmem:[%s1406_s0] sm:$0x7] }
  0x45   :  { %378 = vperm.xlu1 %964, %v53_v17   ;;  %v1255_v4 = vrot.slane %v32_v2, %v147_v63  ;;  %v1257_v5 = vrot.slane %v32_v2, %v327_v1 }
  0x48   :  { %270 = vperm.xlu0 %981, %v51_v8  }
  0x49   :  { %382 = vperm.xlu1 %964, %v54_v9  }
  0x4c   :  { %278 = vperm.xlu0 %981, %v53_v17  }
  0x4d   :  { %965 = vset.pattern.permute.xlu1 %v996_v0 }
  0x4e   :  { %202 = vperm.xlu1 %965, %v40_v26  }
  0x50   :  { %286 = vperm.xlu0 %981, %v55_v25  }
  0x52   :  { %966 = vset.pattern.permute.xlu1 %v997_v6 }
  0x53   :  { %290 = vperm.xlu1 %966, %v1091_v12  }
  0x54   :  { %294 = vperm.xlu0 %981, %v57_v27  }
  0x57   :  { %967 = vset.pattern.permute.xlu1 %v996_v0 }
  0x58   :  { %302 = vperm.xlu0 %981, %v59_v28   ;;  %107 = vperm.xlu1 %967, %v57_v27  }
  0x5c   :  { %310 = vperm.xlu0 %981, %v61_v29   ;;  %968 = vset.pattern.permute.xlu1 %v998_v11 }
  0x5d   :  { %386 = vperm.xlu1 %968, %v55_v25  }
  0x60   :  { %318 = vperm.xlu0 %981, %v1175_v30  }
  0x61   :  { %390 = vperm.xlu1 %968, %v1091_v12  }
  0x64   :  { %985 = vset.pattern.permute.xlu0 %v998_v11 }
  0x65   :  { %422 = vperm.xlu0 %985, %v1141_v23   ;;  %969 = vset.pattern.permute.xlu1 %v996_v0 }
  0x66   :  { %212 = vperm.xlu1 %969, %v42_v31  }
  0x69   :  { %987 = vset.pattern.permute.xlu0 %v996_v0 }
  0x6a   :  { %970 = vset.pattern.permute.xlu1 %v997_v6 }
  0x6b   :  { %298 = vperm.xlu1 %970, %v1104_v15  }
  0x6f   :  { %971 = vset.pattern.permute.xlu1 %v996_v0 }
  0x70   :  { %117 = vperm.xlu1 %971, %v59_v28  }
  0x74   :  { %972 = vset.pattern.permute.xlu1 %v998_v11 }
  0x75   :  { %394 = vperm.xlu1 %972, %v57_v27  }
  0x79   :  { %398 = vperm.xlu1 %972, %v1104_v15  }
  0x7d   :  { %973 = vset.pattern.permute.xlu1 %v996_v0 }
  0x7e   :  { %222 = vperm.xlu1 %973, %v44_v32  }
  0x81   :  { %v1195_v33 = vpop.permute.xlu1 %167 }
  0x82   :  { %v1197_v34 = vpop.permute.xlu0 %67  ;;  %974 = vset.pattern.permute.xlu1 %v997_v6 }
  0x83   :  { %306 = vperm.xlu1 %974, %v1118_v18  }
  0x85   :  { %v1201_v35 = vpop.permute.xlu1 %172 }
  0x86   :  { %v73_v36 = vpop.permute.xlu0 %72 }
  0x87   :  { %975 = vset.pattern.permute.xlu1 %v996_v0  ;;  %v150_v8 = vmul.f32 %v1255_v4, %v73_v36 }
  0x88   :  { %127 = vperm.xlu1 %975, %v61_v29  }
  0x89   :  { %v246_v14 = vadd.f32 %v1201_v35, %v150_v8 }
  0x8a   :  { %v83_v37 = vpop.permute.xlu0 %82  ;;  %v267_v38 = vpop.permute.xlu1 %266 }
  0x8b   :  { %v330_v10 = vmul.f32 %v1257_v5, %v267_v38  ;;  %v152_v15 = vmul.f32 %v1255_v4, %v83_v37 }
  0x8c   :  { %976 = vset.pattern.permute.xlu1 %v998_v11 }
  0x8d   :  { %402 = vperm.xlu1 %976, %v59_v28   ;;  %v346_v17 = vadd.f32 %v330_v10, %v246_v14  ;;  %v487_v14 = vld [vmem:[%s1408_s5 + $0x10] sm:$0xff] }
  0x8e   :  { %v1205_v39 = vpop.permute.xlu0 %177  ;;  %505 = vperm.xlu0 %987, %v487_v14  }
  0x8f   :  { %v1207_v40 = vpop.permute.xlu1 %77 }
  0x90   :  { %v151_v21 = vmul.f32 %v1255_v4, %v1207_v40 }
  0x91   :  { %406 = vperm.xlu1 %976, %v1118_v18  }
  0x92   :  { %v1210_v41 = vpop.permute.xlu0 %92 }
  0x93   :  { %v154_v27 = vmul.f32 %v1255_v4, %v1210_v41 }
  0x94   :  { %v1215_v43 = vpop.permute.xlu1 %362 }
  0x95   :  { %977 = vset.pattern.permute.xlu1 %v996_v0 }
  0x96   :  { %v1218_v44 = vpop.permute.xlu0 %187  ;;  %232 = vperm.xlu1 %977, %v46_v42  }
  0x98   :  { %v367_v45 = vpop.permute.xlu1 %366 }
  0x9a   :  { %v1220_v46 = vpop.permute.xlu0 %102  ;;  %978 = vset.pattern.permute.xlu1 %v997_v6 }
  0x9b   :  { %314 = vperm.xlu1 %978, %v1128_v20  }
  0x9d   :  { %v183_v47 = vpop.permute.xlu1 %182 }
  0x9e   :  { %v1224_v48 = vpop.permute.xlu0 %197  ;;  %v248_v24 = vadd.f32 %v183_v47, %v152_v15 }
  0x9f   :  { %979 = vset.pattern.permute.xlu1 %v996_v0 }
  0xa0   :  { %137 = vperm.xlu1 %979, %v1175_v30  }
  0xa2   :  { %v1228_v49 = vpop.permute.xlu0 %112  ;;  %v275_v50 = vpop.permute.xlu1 %274 }
  0xa4   :  { %980 = vset.pattern.permute.xlu1 %v998_v11 }
  0xa5   :  { %410 = vperm.xlu1 %980, %v61_v29  }
  0xa6   :  { %v1231_v51 = vpop.permute.xlu0 %207 }
  0xa7   :  { %v88_v52 = vpop.permute.xlu1 %87 }
  0xa8   :  { %v153_v31 = vmul.f32 %v1255_v4, %v88_v52 }
  0xa9   :  { %414 = vperm.xlu1 %980, %v1128_v20  }
  0xaa   :  { %v1234_v53 = vpop.permute.xlu0 %122 }
  0xac   :  { %v371_v55 = vpop.permute.xlu1 %370 }
  0xad   :  { %982 = vset.pattern.permute.xlu1 %v996_v0 }
  0xae   :  { %v1240_v56 = vpop.permute.xlu0 %217  ;;  %242 = vperm.xlu1 %982, %v48_v54  }
  0xb0   :  { %v375_v58 = vpop.permute.xlu1 %374 }
  0xb2   :  { %v1242_v59 = vpop.permute.xlu0 %132  ;;  %983 = vset.pattern.permute.xlu1 %v997_v6  ;;  %v427_v6 = vsub.s32 2, %v146_v60 }
  0xb3   :  { %322 = vperm.xlu1 %983, %v1141_v23  }
  0xb4   :  { %v1264_v12 = vrot.slane %v32_v2, %v427_v6 }
  0xb5   :  { %v193_v61 = vpop.permute.xlu1 %192 }
  0xb6   :  { %v1246_v62 = vpop.permute.xlu0 %227  ;;  %v430_v16 = vmul.f32 %v1264_v12, %v367_v45  ;;  %v432_v25 = vmul.f32 %v1264_v12, %v375_v58  ;;  %v429_v28 = vmul.f32 %v1264_v12, %v1215_v43  ;;  %v431_v38 = vmul.f32 %v1264_v12, %v371_v55 }
  0xb7   :  { %984 = vset.pattern.permute.xlu1 %v998_v11  ;;  %v149_v11 = vmul.f32 %v1255_v4, %v1197_v34  ;;  %v250_v42 = vadd.f32 %v193_v61, %v154_v27 }
  0xb8   :  { %418 = vperm.xlu1 %984, %v1175_v30   ;;  %v446_v23 = vadd.f32 %v430_v16, %v346_v17  ;;  %v486_v16 = vld [vmem:[%s1408_s5 + $0x8] sm:$0xff] }
  0xb9   :  { %v245_v20 = vadd.f32 %v1195_v33, %v149_v11  ;;  %v247_v33 = vadd.f32 %v1205_v39, %v151_v21  ;;  %v490_v17 = vld [vmem:[%s1408_s5 + $0x28] sm:$0xff] }
  0xba   :  { %v1253_v3 = vpop.permute.xlu0 %142  ;;  %v283_v7 = vpop.permute.xlu1 %282  ;;  %v462_v37 = vmax.f32 %v446_v23, 0.0  ;;  %520 = vperm.xlu0 %987, %v490_v17  }
  0xbb   :  { %v334_v34 = vmul.f32 %v1257_v5, %v283_v7 }
  0xbc   :  { %986 = vset.pattern.permute.xlu1 %v996_v0  ;;  %v332_v0 = vmul.f32 %v1257_v5, %v275_v50  ;;  %v249_v50 = vadd.f32 %v1218_v44, %v153_v31  ;;  %v485_v44 = vld [vmem:[%s1408_s5] sm:$0xff] }
  0xbd   :  { %v350_v54 = vadd.f32 %v334_v34, %v250_v42  ;;  %495 = vperm.xlu1 %986, %v485_v44  }
  0xbe   :  { %v1261_v9 = vpop.permute.xlu0 %237  ;;  %v348_v30 = vadd.f32 %v332_v0, %v248_v24  ;;  %v489_v24 = vld [vmem:[%s1408_s5 + $0x20] sm:$0xff] }
  0xbf   :  { %v1268_v13 = vpop.permute.xlu1 %97 }
  0xc0   :  { %v448_v40 = vadd.f32 %v432_v25, %v348_v30  ;;  %v155_v21 = vmul.f32 %v1255_v4, %v1268_v13  ;;  %v491_v30 = vld [vmem:[%s1408_s5 + $0x30] sm:$0xff] }
  0xc1   :  { %500 = vperm.xlu1 %986, %v486_v16  }
  0xc2   :  { %v464_v60 = vmax.f32 %v448_v40, 0.0  ;;  %v251_v27 = vadd.f32 %v1224_v48, %v155_v21  ;;  %v647_v48 = vld [vmem:[%s1410_s7] sm:$0x3f] }
  0xc3   :  { %v263_v18 = vpop.permute.xlu0 %262 }
  0xc4   :  { %v329_v22 = vmul.f32 %v1257_v5, %v263_v18  ;;  %v379_v26 = vpop.permute.xlu1 %378  ;;  %v488_v18 = vld [vmem:[%s1408_s5 + $0x18] sm:$0xff] }
  0xc5   :  { %v433_v63 = vmul.f32 %v1264_v12, %v379_v26  ;;  %510 = vperm.xlu1 %986, %v488_v18   ;;  %v727_v26 = vld [vmem:[%s1409_s8] sm:$0xff] }
  0xc6   :  { %v345_v29 = vadd.f32 %v329_v22, %v245_v20  ;;  %v492_v20 = vld [vmem:[%s1408_s5 + $0x38] sm:$0xff]  ;;  %v156_v22 = vmul.f32 %v1255_v4, %v1220_v46 }
  0xc7   :  { %v271_v32 = vpop.permute.xlu0 %270  ;;  %530 = vperm.xlu0 %987, %v492_v20  }
  0xc8   :  { %v331_v35 = vmul.f32 %v1257_v5, %v271_v32  ;;  %v445_v36 = vadd.f32 %v429_v28, %v345_v29  ;;  %v383_v41 = vpop.permute.xlu1 %382 }
  0xc9   :  { %v434_v43 = vmul.f32 %v1264_v12, %v383_v41  ;;  %515 = vperm.xlu1 %986, %v489_v24   ;;  %v728_v41 = vld [vmem:[%s1409_s8 + $0x8] sm:$0xf] }
  0xca   :  { %v347_v45 = vadd.f32 %v331_v35, %v247_v33  ;;  %v461_v47 = vmax.f32 %v445_v36, 0.0 }
  0xcb   :  { %v279_v52 = vpop.permute.xlu0 %278  ;;  %v450_v55 = vadd.f32 %v434_v43, %v350_v54  ;;  %731 = vperm.xlu0 %987, %v727_v26  }
  0xcc   :  { %v447_v39 = vadd.f32 %v431_v38, %v347_v45  ;;  %v333_v57 = vmul.f32 %v1257_v5, %v279_v52  ;;  %v902_v58 = vpack.c.bf16 %v462_v37, %v461_v47 }
  0xcd   :  { %v203_v6 = vpop.permute.xlu1 %202  ;;  %v466_v8 = vmax.f32 %v450_v55, 0.0  ;;  %525 = vperm.xlu1 %986, %v491_v30  }
  0xce   :  { %v463_v1 = vmax.f32 %v447_v39, 0.0  ;;  %v349_v2 = vadd.f32 %v333_v57, %v249_v50  ;;  %903 = vmatprep.subr.bf16.mxu0 %v902_v58  ;;  %v252_v46 = vadd.f32 %v203_v6, %v156_v22  ;;  %v158_v39 = vmul.f32 %v1255_v4, %v1228_v49 }
  0xcf   :  { %905 = vmatpush3.bf16.msra.mxu0 %v902_v58  ;;  %v287_v19 = vpop.permute.xlu0 %286 }
  0xd0   :  { %v449_v61 = vadd.f32 %v433_v63, %v349_v2  ;;  %v906_v7 = vpack.c.bf16 %v464_v60, %v463_v1  ;;  %v335_v23 = vmul.f32 %v1257_v5, %v287_v19 }
  0xd1   :  { %650 = vperm.xlu1 %986, %v647_v48  }
  0xd2   :  { %v465_v10 = vmax.f32 %v449_v61, 0.0  ;;  %907 = vmatprep.subr.bf16.mxu0 %v906_v7  ;;  %v291_v11 = vpop.permute.xlu1 %290  ;;  %v351_v29 = vadd.f32 %v335_v23, %v251_v27 }
  0xd3   :  { %909 = vmatpush3.bf16.msra.mxu0 %v906_v7  ;;  %v336_v13 = vmul.f32 %v1257_v5, %v291_v11  ;;  %v295_v47 = vpop.permute.xlu0 %294 }
  0xd4   :  { %v910_v15 = vpack.c.bf16 %v466_v8, %v465_v10  ;;  %v337_v52 = vmul.f32 %v1257_v5, %v295_v47 }
  0xd5   :  { %v352_v32 = vadd.f32 %v336_v13, %v252_v46  ;;  %786 = vperm.xlu1 %986, %v728_v41  }
  0xd6   :  { %911 = vmatprep.subr.bf16.mxu0 %v910_v15 }
  0xd7   :  { %913 = vmatpush3.bf16.msra.mxu0 %v910_v15  ;;  %v108_v0 = vpop.permute.xlu1 %107  ;;  %v303_v14 = vpop.permute.xlu0 %302 }
  0xd8   :  { %v157_v45 = vmul.f32 %v1255_v4, %v108_v0  ;;  %v339_v16 = vmul.f32 %v1257_v5, %v303_v14  ;;  %v160_v0 = vmul.f32 %v1255_v4, %v1234_v53  ;;  %v484_v14 = vld [vmem:[%s1407_s4 + $0x38] sm:$0xff] }
  0xda   :  { %v253_v50 = vadd.f32 %v1231_v51, %v157_v45 }
  0xdb   :  { %v311_v30 = vpop.permute.xlu0 %310 }
  0xdc   :  { %v387_v25 = vpop.permute.xlu1 %386  ;;  %v353_v60 = vadd.f32 %v337_v52, %v253_v50 }
  0xdd   :  { %v435_v28 = vmul.f32 %v1264_v12, %v387_v25 }
  0xdf   :  { %v451_v33 = vadd.f32 %v435_v28, %v351_v29 }
  0xe0   :  { %v391_v31 = vpop.permute.xlu1 %390 }
  0xe1   :  { %v436_v34 = vmul.f32 %v1264_v12, %v391_v31  ;;  %v467_v36 = vmax.f32 %v451_v33, 0.0 }
  0xe3   :  { %v452_v35 = vadd.f32 %v436_v34, %v352_v32  ;;  %v341_v32 = vmul.f32 %v1257_v5, %v311_v30  ;;  %v162_v34 = vmul.f32 %v1255_v4, %v1242_v59  ;;  %v164_v59 = vmul.f32 %v1255_v4, %v1253_v3 }
  0xe5   :  { %v468_v37 = vmax.f32 %v452_v35, 0.0  ;;  %v213_v38 = vpop.permute.xlu1 %212 }
  0xe6   :  { %v254_v63 = vadd.f32 %v213_v38, %v158_v39 }
  0xe7   :  { %v914_v40 = vpack.c.bf16 %v468_v37, %v467_v36 }
  0xe9   :  { %915 = vmatprep.subr.bf16.mxu0 %v914_v40 }
  0xea   :  { %v299_v42 = vpop.permute.xlu1 %298  ;;  %917 = vmatpush3.bf16.msra.mxu0 %v914_v40 }
  0xeb   :  { %v338_v57 = vmul.f32 %v1257_v5, %v299_v42 }
  0xed   :  { %v354_v55 = vadd.f32 %v338_v57, %v254_v63 }
  0xef   :  { %v118_v43 = vpop.permute.xlu1 %117 }
  0xf0   :  { %v159_v49 = vmul.f32 %v1255_v4, %v118_v43  ;;  %v319_v43 = vpop.permute.xlu0 %318 }
  0xf2   :  { %v255_v15 = vadd.f32 %v1240_v56, %v159_v49  ;;  %v482_v49 = vld [vmem:[%s1407_s4 + $0x28] sm:$0xff] }
  0xf4   :  { %v395_v54 = vpop.permute.xlu1 %394  ;;  %v355_v20 = vadd.f32 %v339_v16, %v255_v15  ;;  %v423_v39 = vpop.permute.xlu0 %422  ;;  %v999_v15 = vmov 0.0|0.0   ;;  %v1001_v16 = vmov 0.0  }
  0xf5   :  { %v437_v58 = vmul.f32 %v1264_v12, %v395_v54  ;;  %934 = vmatprep.subr.bf16.mxu1 %v999_v15  ;;  %899 = vmatprep.mubr.msk.f32.mxu1 %vm1000_vm0, %v1001_v16 }
  0xf7   :  { %v453_v2 = vadd.f32 %v437_v58, %v353_v60 }
  0xf8   :  { %v399_v1 = vpop.permute.xlu1 %398 }
  0xf9   :  { %v438_v6 = vmul.f32 %v1264_v12, %v399_v1  ;;  %v469_v7 = vmax.f32 %v453_v2, 0.0  ;;  %v444_v1 = vmul.f32 %v1264_v12, %v423_v39  ;;  %v343_v2 = vmul.f32 %v1257_v5, %v319_v43 }
  0xfb   :  { %v454_v61 = vadd.f32 %v438_v6, %v354_v55 }
  0xfd   :  { %v470_v51 = vmax.f32 %v454_v61, 0.0  ;;  %v223_v8 = vpop.permute.xlu1 %222 }
  0xfe   :  { %v256_v21 = vadd.f32 %v223_v8, %v160_v0 }
  0xff   :  { %v918_v10 = vpack.c.bf16 %v470_v51, %v469_v7 }
 0x101   :  { %919 = vmatprep.subr.bf16.mxu0 %v918_v10 }
 0x102   :  { %v307_v44 = vpop.permute.xlu1 %306  ;;  %921 = vmatpush3.bf16.msra.mxu0 %v918_v10 }
 0x103   :  { %v340_v18 = vmul.f32 %v1257_v5, %v307_v44  ;;  %v479_v44 = vld [vmem:[%s1407_s4 + $0x10] sm:$0xff] }
 0x105   :  { %v356_v23 = vadd.f32 %v340_v18, %v256_v21 }
 0x107   :  { %v128_v11 = vpop.permute.xlu1 %127 }
 0x108   :  { %v161_v53 = vmul.f32 %v1255_v4, %v128_v11  ;;  %v483_v11 = vld [vmem:[%s1407_s4 + $0x30] sm:$0xff] }
 0x10a   :  { %v257_v31 = vadd.f32 %v1246_v62, %v161_v53 }
 0x10c   :  { %v403_v17 = vpop.permute.xlu1 %402  ;;  %v357_v36 = vadd.f32 %v341_v32, %v257_v31 }
 0x10d   :  { %v439_v19 = vmul.f32 %v1264_v12, %v403_v17  ;;  %v506_v18 = vpop.permute.xlu0 %505 }
 0x10f   :  { %v455_v24 = vadd.f32 %v439_v19, %v355_v20 }
 0x110   :  { %v407_v22 = vpop.permute.xlu1 %406 }
 0x111   :  { %v440_v25 = vmul.f32 %v1264_v12, %v407_v22  ;;  %v471_v27 = vmax.f32 %v455_v24, 0.0 }
 0x113   :  { %v456_v26 = vadd.f32 %v440_v25, %v356_v23 }
 0x115   :  { %v472_v56 = vmax.f32 %v456_v26, 0.0  ;;  %v233_v13 = vpop.permute.xlu1 %232 }
 0x116   :  { %v258_v37 = vadd.f32 %v233_v13, %v162_v34 }
 0x117   :  { %v922_v28 = vpack.c.bf16 %v472_v56, %v471_v27 }
 0x119   :  { %923 = vmatprep.subr.bf16.mxu0 %v922_v28 }
 0x11a   :  { %v315_v46 = vpop.permute.xlu1 %314  ;;  %925 = vmatpush3.bf16.msra.mxu0 %v922_v28 }
 0x11b   :  { %v342_v35 = vmul.f32 %v1257_v5, %v315_v46 }
 0x11d   :  { %v358_v40 = vadd.f32 %v342_v35, %v258_v37 }
 0x11f   :  { %v138_v29 = vpop.permute.xlu1 %137 }
 0x120   :  { %v163_v54 = vmul.f32 %v1255_v4, %v138_v29 }
 0x122   :  { %v259_v63 = vadd.f32 %v1261_v9, %v163_v54  ;;  %v478_v9 = vld [vmem:[%s1407_s4 + $0x8] sm:$0xff] }
 0x124   :  { %v411_v33 = vpop.permute.xlu1 %410  ;;  %v359_v7 = vadd.f32 %v343_v2, %v259_v63  ;;  %v740_v2 = vld [vmem:[%s1412_s1] sm:$0x7] }
 0x125   :  { %v441_v48 = vmul.f32 %v1264_v12, %v411_v33 }
 0x127   :  { %v457_v41 = vadd.f32 %v441_v48, %v357_v36 }
 0x128   :  { %v415_v38 = vpop.permute.xlu1 %414 }
 0x129   :  { %v442_v42 = vmul.f32 %v1264_v12, %v415_v38  ;;  %v473_v62 = vmax.f32 %v457_v41, 0.0 }
 0x12b   :  { %v458_v45 = vadd.f32 %v442_v42, %v358_v40 }
 0x12d   :  { %v474_v47 = vmax.f32 %v458_v45, 0.0  ;;  %v243_v50 = vpop.permute.xlu1 %242 }
 0x12e   :  { %v260_v58 = vadd.f32 %v243_v50, %v164_v59 }
 0x12f   :  { %v926_v52 = vpack.c.bf16 %v474_v47, %v473_v62 }
 0x131   :  { %927 = vmatprep.subr.bf16.mxu0 %v926_v52 }
 0x132   :  { %v323_v57 = vpop.permute.xlu1 %322  ;;  %929 = vmatpush3.bf16.msra.mxu0 %v926_v52  ;;  %v646_v52 = vld [vmem:[%s1411_s6] sm:$0x3f] }
 0x133   :  { %v344_v60 = vmul.f32 %v1257_v5, %v323_v57  ;;  %v480_v5 = vld [vmem:[%s1407_s4 + $0x18] sm:$0xff] }
 0x135   :  { %v360_v55 = vadd.f32 %v344_v60, %v260_v58 }
 0x137   :  { %v419_v6 = vpop.permute.xlu1 %418  ;;  %v460_v61 = vadd.f32 %v444_v1, %v360_v55 }
 0x138   :  { %v443_v51 = vmul.f32 %v1264_v12, %v419_v6  ;;  %v481_v12 = vld [vmem:[%s1407_s4 + $0x20] sm:$0xff]  ;;  %v742_v6 = vrot.slane %v740_v2, 5 }
 0x139   :  { %v476_v4 = vmax.f32 %v460_v61, 0.0  ;;  %v521_v13 = vpop.permute.xlu0 %520 }
 0x13a   :  { %v459_v3 = vadd.f32 %v443_v51, %v359_v7 }
 0x13c   :  { %v475_v8 = vmax.f32 %v459_v3, 0.0  ;;  %v496_v17 = vpop.permute.xlu1 %495 }
 0x13e   :  { %v930_v10 = vpack.c.bf16 %v476_v4, %v475_v8 }
 0x140   :  { %931 = vmatprep.subr.bf16.mxu0 %v930_v10  ;;  %v501_v0 = vpop.permute.xlu1 %500 }
 0x141   :  { %933 = vmatpush3.bf16.msra.mxu0 %v930_v10 }
 0x144   :  { %872 = vmatmul.mubr.f32.vlgmr.msra.gmra.mrb[0].mxu0 %v478_v9  ;;  %v511_v20 = vpop.permute.xlu1 %510 }
 0x145   :  { %874 = vmatprep.mubr.f32.mxu0 %v479_v44 }
 0x146   :  { %v531_v36 = vpop.permute.xlu0 %530 }
 0x148   :  { %875 = vmatmul.mubr.f32.gmra.mrb[2].mxu0 %v480_v5  ;;  %v516_v53 = vpop.permute.xlu1 %515 }
 0x149   :  { %877 = vmatprep.mubr.f32.mxu0 %v481_v12 }
 0x14a   :  { %v732_v54 = vpop.permute.xlu0 %731 }
 0x14b   :  { %v733_v57 = vrot.slane %v732_v54, 5  ;;  %v789_v5 = vrot.slane %v732_v54, 6 }
 0x14c   :  { %878 = vmatmul.mubr.f32.gmra.mrb[4].mxu0 %v482_v49  ;;  %v526_v40 = vpop.permute.xlu1 %525 }
 0x14d   :  { %880 = vmatprep.mubr.f32.mxu0 %v483_v11 }
 0x150   :  { %881 = vmatmul.mubr.f32.gmra.mrb[6].mxu0 %v484_v14  ;;  %v651_v59 = vpop.permute.xlu1 %650 }
 0x154   :  { %v787_v10 = vpop.permute.xlu1 %786 }
 0x155   :  { %v790_v44 = vrot.slane %v787_v10, 6  ;;  %v794_v14 = vrot.slane %v787_v10, 1 }
 0x157   :  { %v791_v11 = vsel %vm788_vm2, %v789_v5, %v790_v44 }
 0x217   :  { %v873_v19 = vpop.f32.mrb[0].mxu0 }
 0x218   :  { %v605_v21 = vadd.f32 %v873_v19, %v501_v0  ;;  %v599_v22 = vpop.f32.mrb[1].mxu0 }
 0x219   :  { %v600_v23 = vadd.f32 %v599_v22, %v496_v17 }
 0x21a   :  { %v639_v24 = vmax.f32 %v605_v21, 0.0 }
 0x21b   :  { %v638_v25 = vmax.f32 %v600_v23, 0.0  ;;  %v876_v26 = vpop.f32.mrb[2].mxu0 }
 0x21c   :  { %v615_v27 = vadd.f32 %v876_v26, %v511_v20  ;;  %v609_v56 = vpop.f32.mrb[3].mxu0 }
 0x21d   :  { %v610_v28 = vadd.f32 %v609_v56, %v506_v18  ;;  %v935_v46 = vpack.c.bf16 %v639_v24, %v638_v25  ;;  %v767_v25 = vmul.f32 %v740_v2, %v740_v2 }
 0x21e   :  { %v641_v29 = vmax.f32 %v615_v27, 0.0 }
 0x21f   :  { %v640_v30 = vmax.f32 %v610_v28, 0.0  ;;  %v879_v31 = vpop.f32.mrb[4].mxu0  ;;  %936 = vmatpush3.bf16.msra.mxu1 %v935_v46 }
 0x220   :  { %v625_v32 = vadd.f32 %v879_v31, %v521_v13  ;;  %v619_v33 = vpop.f32.mrb[5].mxu0  ;;  %937 = vmatprep.subr.bf16.mxu1 %v999_v15  ;;  %v768_v13 = vmul.f32 0.5, %v767_v25 }
 0x221   :  { %v938_v34 = vpack.c.bf16 %v641_v29, %v640_v30  ;;  %v620_v35 = vadd.f32 %v619_v33, %v516_v53 }
 0x222   :  { %v643_v48 = vmax.f32 %v625_v32, 0.0 }
 0x223   :  { %v642_v37 = vmax.f32 %v620_v35, 0.0  ;;  %v882_v38 = vpop.f32.mrb[6].mxu0  ;;  %939 = vmatpush3.bf16.msra.mxu1 %v938_v34 }
 0x224   :  { %v635_v41 = vadd.f32 %v882_v38, %v531_v36  ;;  %v629_v42 = vpop.f32.mrb[7].mxu0  ;;  %940 = vmatprep.subr.bf16.mxu1 %v999_v15 }
 0x225   :  { %v941_v45 = vpack.c.bf16 %v643_v48, %v642_v37  ;;  %v630_v43 = vadd.f32 %v629_v42, %v526_v40 }
 0x226   :  { %v645_v62 = vmax.f32 %v635_v41, 0.0 }
 0x227   :  { %v644_v47 = vmax.f32 %v630_v43, 0.0  ;;  %942 = vmatpush3.bf16.msra.mxu1 %v941_v45 }
 0x228   :  { %943 = vmatprep.subr.bf16.mxu1 %v999_v15 }
 0x229   :  { %v944_v50 = vpack.c.bf16 %v645_v62, %v644_v47 }
 0x22b   :  { %945 = vmatpush3.bf16.msra.mxu1 %v944_v50 }
 0x22e   :  { %900 = vmatmul.mubr.msk.f32.vlgmr.msra.gmra.mrb[0].mxu1 %vm653_vm1, %v646_v52 }
 0x301   :  { %v723_v39 = vpop.f32.mrb[0].mxu1 }
 0x302   :  { %v724_v58 = vadd.f32 %v723_v39, %v651_v59  ;;  %v901_v60 = vpop.f32.mrb[1].mxu1 }
 0x304   :  { %v735_v63 = vmax.f32 %v724_v58, %v733_v57 }
 0x306   :  { %v737_v1 = vmin.f32 %v735_v63, %v732_v54 }
 0x308   :  { %v738_v55 = vmul.f32 1.442695, %v737_v1  ;;  %v771_v53 = vrot.slane %v737_v1, 3 }
 0x30a   :  { %988 = vpow2.f32 %v738_v55 }
 0x314   :  { %v989_v61 = vpop.eup %988 }
 0x315   :  { %v744_v7 = vmul.f32 %v989_v61, %v742_v6 }
 0x317   :  { %v746_v51 = vrot.slane %v744_v7, 3 }
 0x319   :  { %v748_v3 = vadd.f32 %v746_v51, %v724_v58 }
 0x31b   :  { %v749_v4 = vmul.f32 -2.0, %v748_v3  ;;  %990 = vtanh.f32 %v748_v3 }
 0x31d   :  { %v751_v8 = vand.u32 2147483647, %v749_v4  ;;  %v750_v24 = vmax.f32 %v749_v4, 0.0 }
 0x31f   :  { %v752_v9 = vsub.f32 0.0, %v751_v8 }
 0x321   :  { %v753_v12 = vmul.f32 1.442695, %v752_v9 }
 0x323   :  { %992 = vpow2.f32 %v753_v12 }
 0x325   :  { %v991_v49 = vpop.eup %990 }
 0x326   :  { %v793_v15 = vmul.f32 %v991_v49, %v791_v11 }
 0x328   :  { %v796_v16 = vadd.f32 %v794_v14, %v793_v15 }
 0x32a   :  { %797 = vst.msk [vmem:[%s1413_s9] sm:$0x7] %vm774_vm3, %v796_v16 }
 0x32d   :  { %v993_v17 = vpop.eup %992 }
 0x32e   :  { %v755_v0 = vadd.f32 1.0, %v993_v17  ;;  %v758_v18 = vmul.f32 -0.5, %v993_v17  ;;  %v761_v20 = vand.u32 2147483647, %v993_v17 }
 0x330   :  { %994 = vlog2.f32 %v755_v0  ;;  %v759_v19 = vadd.f32 1.0, %v758_v18  ;;  %vm762_vm4 = vcmp.lt.f32.partialorder %v761_v20, 0.0004427343 }
 0x332   :  { %v760_v23 = vmul.f32 %v993_v17, %v759_v19 }
 0x33a   :  { %v995_v21 = vpop.eup %994 }
 0x33b   :  { %v757_v22 = vmul.f32 0.6931472, %v995_v21 }
 0x33d   :  { %v763_v26 = vsel %vm762_vm4, %v760_v23, %v757_v22 }
 0x33e   :  { %v764_v27 = vadd.f32 %v763_v26, %v750_v24 }
 0x340   :  { %v765_v56 = vadd.f32 %v764_v27, %v748_v3 }
 0x342   :  { %v766_v28 = vmul.f32 2.0, %v765_v56 }
 0x344   :  { %v769_v46 = vsub.f32 %v766_v28, %v768_v13 }
 0x346   :  { %v773_v29 = vsub.f32 %v769_v46, %v771_v53 }
 0x348   :  { %v775_v30 = vsel %vm774_vm3, %v773_v29, 0.0 }
 0x349   :  { %v776_v31 = vrot.slane %v775_v30, 4 }
 0x34b   :  { %v777_v32 = vadd.f32 %v776_v31, %v775_v30 }
 0x34d   :  { %v778_v33 = vrot.slane %v777_v32, 2 }
 0x34f   :  { %v779_v34 = vadd.f32 %v778_v33, %v777_v32 }
 0x351   :  { %v780_v35 = vrot.slane %v779_v34, 1 }
 0x353   :  { %v781_v48 = vadd.f32 %v780_v35, %v779_v34 }
 0x355   :  { %v805_v36 = vadd.f32 -6.9156985, %v781_v48 }
 0x357   :  { %799 = vst.msk [vmem:[%s1413_s9 + $0x3] sm:$0x1] %vm798_vm5, %v805_v36 }

</bundles_post_ra>
